<compile_context>
chip_gen: v7x
topology: tpu7x:2x2x1
jax: 0.10.0
libtpu: 0.0.40
codegen_flags: <defaults>
</compile_context>

<pallas_src>
import math
import functools

import jax
import jax.numpy as jnp
from jax import lax
from jax.experimental import pallas as pl
from jax.experimental.pallas import tpu as pltpu


_VMEM_LIMIT_BYTES = 48 * 1024 * 1024   # > scoped defaults; safe on v7x (64 MiB phys)
_BLOCK_BYTE_TARGET = 4 * 1024 * 1024   # per-input block target (double-buffered)


def _round_up(a, m):
    return ((a + m - 1) // m) * m


def _sublane(dtype):
    # Native sublane packing: 8 rows for 32-bit, 16 for 16-bit, 32 for 8-bit.
    return 8 * max(1, 4 // jnp.dtype(dtype).itemsize)


def _pick_rows_cols(n, h):
    """Pick a lane-dense 2-D slab (rows, cols) holding the n*h output elements.

    The op is purely elementwise and the de-interleaved halves are contiguous,
    so any reshape of the flat n*h elements is legal.  Keep the natural (n, h)
    shape when h is already lane friendly; otherwise re-slab so the last dim is
    a large multiple of 128 (avoids masked vst.msk partial stores).
    """
    total = n * h
    if h % 128 == 0 and h <= 16384:
        return n, h
    if total % 128 == 0:
        for lanes in (8192, 4096, 2048, 1024, 512, 256, 128):
            if total % lanes == 0 and total // lanes >= 8:
                return total // lanes, lanes
    return n, h


def _pick_tm(rows, cols, itemsize, sub):
    """Largest row tile (multiple of `sub`) keeping a block near the byte target."""
    cap = (_BLOCK_BYTE_TARGET // max(1, cols * itemsize)) // sub * sub
    cap = max(sub, cap)
    return min(cap, _round_up(rows, sub))


def _gegelu_math(ag, al, limit):
    if limit is not None:
        # torch.where(isinf(x), x, x.clamp(...)) semantics
        ag = jnp.where(jnp.isinf(ag), ag, jnp.minimum(ag, limit))
        al = jnp.where(jnp.isinf(al), al, jnp.clip(al, -limit, limit))
    # quick_gelu(x) = x * sigmoid(1.702 * x)   (sigmoid -> EUP, free-ish slot)
    return (ag * jax.nn.sigmoid(1.702 * ag)) * (al + 1.0)


def _gegelu_split_kernel(ag_ref, al_ref, o_ref, *, limit):
    ag = ag_ref[...].astype(jnp.float32)
    al = al_ref[...].astype(jnp.float32)
    o_ref[...] = _gegelu_math(ag, al, limit).astype(o_ref.dtype)


def _gegelu_packed_bf16_kernel(u_ref, o_ref, *, limit, even_in_low16):
    # Each uint32 lane holds one (even, odd) bf16 pair of the interleaved
    # activation.  bf16 -> f32 is "place the 16 bits in the f32 high half",
    # so the split is pure VPU bit work (no lane shuffles, no extra HBM pass).
    u = u_ref[...]
    lo = u << 16                        # low 16 bits moved to the f32 high half
    hi = u & jnp.uint32(0xFFFF0000)     # high 16 bits already in the high half
    ag_bits, al_bits = (lo, hi) if even_in_low16 else (hi, lo)
    ag = pltpu.bitcast(ag_bits, jnp.float32)
    al = pltpu.bitcast(al_bits, jnp.float32)
    o_ref[...] = _gegelu_math(ag, al, limit).astype(o_ref.dtype)


@functools.lru_cache(maxsize=None)
def _bf16_even_in_low16():
    """Detect (once) whether bitcast packs element 0 into the low 16 bits."""
    probe = lax.bitcast_convert_type(
        jnp.array([[1.0, 0.0]], dtype=jnp.bfloat16), jnp.uint32)  # shape (1,)
    return bool((int(probe[0]) & 0xFFFF) == 0x3F80)  # 0x3F80 == bf16(1.0)


def _call(kernel, inputs, rows, cols, tm, out_dtype, io_bytes, n_out):
    grid = (pl.cdiv(rows, tm),)
    return pl.pallas_call(
        kernel,
        out_shape=jax.ShapeDtypeStruct((rows, cols), out_dtype),
        grid_spec=pltpu.PrefetchScalarGridSpec(
            num_scalar_prefetch=0,
            grid=grid,
            in_specs=[pl.BlockSpec((tm, cols), lambda i: (i, 0))
                      for _ in inputs],
            out_specs=pl.BlockSpec((tm, cols), lambda i: (i, 0)),
        ),
        compiler_params=pltpu.CompilerParams(
            dimension_semantics=("parallel",),
            vmem_limit_bytes=_VMEM_LIMIT_BYTES,
        ),
        cost_estimate=pl.CostEstimate(
            flops=10 * n_out,
            transcendentals=n_out,
            bytes_accessed=io_bytes,
        ),
    )(*inputs)


def gegelu(x, limit=None):
    """GEGELU forward. x: (..., 2*H) -> (..., H)."""
    *lead, two_h = x.shape
    assert two_h % 2 == 0, "last dim must be even"
    h = two_h // 2
    n = math.prod(lead) if lead else 1
    out_dtype = x.dtype

    rows, cols = _pick_rows_cols(n, h)

    if jnp.dtype(x.dtype) == jnp.dtype(jnp.bfloat16):
        # Fused de-interleave: keep the interleaved layout in HBM and read it
        # exactly once.  The (n, h, 2) -> u32 (n, h) bitcast and the re-slab
        # reshape are free reinterpretations of contiguous memory.
        packed = lax.bitcast_convert_type(
            x.reshape(n, h, 2), jnp.uint32).reshape(rows, cols)
        sub = max(_sublane(jnp.uint32), _sublane(out_dtype))
        tm = _pick_tm(rows, cols, 4, sub)
        kernel = functools.partial(
            _gegelu_packed_bf16_kernel, limit=limit,
            even_in_low16=_bf16_even_in_low16())
        io_bytes = n * h * 4 + n * h * jnp.dtype(out_dtype).itemsize
        out = _call(kernel, (packed,), rows, cols, tm, out_dtype, io_bytes, n * h)
    else:
        # Split path (f32/f16): de-interleave via XLA glue (one multi-output
        # copy fusion), fused elementwise hot loop in the kernel.
        x2 = x.reshape(n, h, 2)
        a_gelu = x2[..., 0].reshape(rows, cols)     # == input[..., ::2]
        a_linear = x2[..., 1].reshape(rows, cols)   # == input[..., 1::2]
        itemsize = jnp.dtype(x.dtype).itemsize
        sub = _sublane(x.dtype)
        tm = _pick_tm(rows, cols, max(4, itemsize), sub)
        kernel = functools.partial(_gegelu_split_kernel, limit=limit)
        io_bytes = 3 * n * h * itemsize
        out = _call(kernel, (a_gelu, a_linear), rows, cols, tm, out_dtype,
                    io_bytes, n * h)

    return out.reshape(*lead, h)


def gegelu_ref(x, limit=None):
    """Pure-JAX reference mirroring the PyTorch module."""
    a_gelu = x[..., ::2]
    a_linear = x[..., 1::2]
    if limit is not None:
        a_gelu = jnp.where(jnp.isinf(a_gelu), a_gelu,
                           jnp.minimum(a_gelu, limit))
        a_linear = jnp.where(jnp.isinf(a_linear), a_linear,
                             jnp.clip(a_linear, -limit, limit))
    out_gelu = a_gelu * jax.nn.sigmoid(1.702 * a_gelu)
    return out_gelu * (a_linear + 1.0)


if __name__ == "__main__":
    key = jax.random.PRNGKey(0)
    # batch=2, seq=8, hidden=32 (-> two 16-wide halves interleaved)
    x = jax.random.normal(key, (2, 8, 32), dtype=jnp.float32) * 3.0
    # sprinkle a few infs to exercise the isinf path
    x = x.at[0, 0, 0].set(jnp.inf).at[1, 3, 5].set(-jnp.inf)

    # f32, limit=None
    y = gegelu(x, limit=None)
    jax.block_until_ready(y)
    assert y.shape == (2, 8, 16)
    assert jnp.allclose(y, gegelu_ref(x, None), atol=1e-5, rtol=1e-5,
                        equal_nan=True)

    # f32, limit=2.0
    y2 = gegelu(x, limit=2.0)
    jax.block_until_ready(y2)
    assert jnp.allclose(y2, gegelu_ref(x, 2.0), atol=1e-5, rtol=1e-5,
                        equal_nan=True)

    # bf16 fused path (in-kernel de-interleave via u32 pair-bitcast)
    xb = x.astype(jnp.bfloat16)
    for lim in (None, 2.0):
        yb = gegelu(xb, limit=lim)
        jax.block_until_ready(yb)
        ref = gegelu_ref(xb.astype(jnp.float32), lim).astype(jnp.bfloat16)
        assert yb.shape == (2, 8, 16)
        assert jnp.allclose(yb.astype(jnp.float32), ref.astype(jnp.float32),
                            atol=2e-2, rtol=2e-2, equal_nan=True)

    print("KERNEL_OK")
</pallas_src>

<mosaic_0001>
module attributes {stable_mosaic.version = 11 : i64} {
  func.func @_gegelu_split_kernel(%arg0: i32, %arg1: memref<16x16xf32, #tpu.memory_space<vmem>>, %arg2: memref<16x16xf32, #tpu.memory_space<vmem>>, %arg3: memref<16x16xf32, #tpu.memory_space<vmem>>) attributes {dimension_semantics = [#tpu.dimension_semantics<parallel>], iteration_bounds = array<i64: 1>, scalar_prefetch = 0 : i64, scratch_operands = 0 : i64, tpu.core_type = #tpu.core_type<tc>, window_params = [{transform_indices = @transform_0, window_bounds = array<i64: 16, 16>}, {transform_indices = @transform_1, window_bounds = array<i64: 16, 16>}, {transform_indices = @transform_2, window_bounds = array<i64: 16, 16>}]} {
    %c0 = arith.constant 0 : index
    %c0_0 = arith.constant 0 : index
    %0 = vector.load %arg1[%c0, %c0_0] : memref<16x16xf32, #tpu.memory_space<vmem>>, vector<16x16xf32>
    %c0_1 = arith.constant 0 : index
    %c0_2 = arith.constant 0 : index
    %1 = vector.load %arg2[%c0_1, %c0_2] : memref<16x16xf32, #tpu.memory_space<vmem>>, vector<16x16xf32>
    %cst = arith.constant 1.702000e+00 : f32
    %2 = vector.broadcast %cst : f32 to vector<16x16xf32>
    %3 = arith.mulf %2, %0 : vector<16x16xf32>
    %4 = arith.negf %3 : vector<16x16xf32>
    %5 = math.exp %4 : vector<16x16xf32>
    %cst_3 = arith.constant 1.000000e+00 : f32
    %6 = vector.broadcast %cst_3 : f32 to vector<16x16xf32>
    %7 = arith.addf %6, %5 : vector<16x16xf32>
    %8 = arith.divf %6, %7 : vector<16x16xf32>
    %9 = arith.mulf %0, %8 : vector<16x16xf32>
    %cst_4 = arith.constant 1.000000e+00 : f32
    %10 = vector.broadcast %cst_4 : f32 to vector<16x16xf32>
    %11 = arith.addf %1, %10 : vector<16x16xf32>
    %12 = arith.mulf %9, %11 : vector<16x16xf32>
    %c0_5 = arith.constant 0 : index
    %c0_6 = arith.constant 0 : index
    %13 = vector.load %arg3[%c0_5, %c0_6] : memref<16x16xf32, #tpu.memory_space<vmem>>, vector<16x16xf32>
    tpu.vector_store %arg3[%c0_5, %c0_6], %12 {strides = array<i32>} : memref<16x16xf32, #tpu.memory_space<vmem>>, vector<16x16xf32>,
    return
  }
  func.func @transform_0(%arg0: i32) -> (i32, i32) {
    %c0_i32 = arith.constant 0 : i32
    %c0_i32_0 = arith.constant 0 : i32
    return %arg0, %c0_i32 : i32, i32
  }
  func.func @transform_1(%arg0: i32) -> (i32, i32) {
    %c0_i32 = arith.constant 0 : i32
    %c0_i32_0 = arith.constant 0 : i32
    return %arg0, %c0_i32 : i32, i32
  }
  func.func @transform_2(%arg0: i32) -> (i32, i32) {
    %c0_i32 = arith.constant 0 : i32
    %c0_i32_0 = arith.constant 0 : i32
    return %arg0, %c0_i32 : i32, i32
  }
}

</mosaic_0001>

<bundles_post_ra>
// kernel: tpu_custom_call.1
= control target key start
LH: loop header
LB: loop body
LE: loop exit
PB: predicated region body
PF: predicated region fallthrough
CT: control target
= control target key end

     0   :  { %7 = vsyncpa [#allocation3], 0  ;;  %s237_s0 = inlined_call_operand.hbm [shape: f32[16,16], index: 0, kind: input, shape index: {}]   ;;  %s238_s1 = inlined_call_operand.hbm [shape: f32[16,16], index: 1, kind: input, shape index: {}]   ;;  %s239_s2 = inlined_call_operand.hbm [shape: f32[16,16], index: 2, kind: output, shape index: {}]  }
   0x1   :  { %8 = vsyncpa [#allocation6], 0 }
   0x2   :  { %9 = vsyncpa [#allocation4], 0  ;;  %s172_s9 = smov [#allocation2]   ;;  %s100_s13 = scalar_lea.hbm %s237_s0, 256 }
   0x3   :  { %s15_s10 = sshll.u32 %s172_s9, 4  ;;  %p101_p0 = scmp.ne.s32.totalorder %s237_s0, %s100_s13  ;;  %s16_s10 = int_to_ptr.vmem [resolvable:$true] %s15_s10 }
   0x4   :  { %p104_p1 = scmp.lt.u32.totalorder %s100_s13, %s237_s0 }
   0x6   :  { %p106_p2 = pnand %p104_p1, %p101_p0 }
   0x8   :  { %109 = shalt.err (!%p106_p2)
}
   0x9   :  { %s110_s18 = scalar_lea.vmem %s16_s10, 256  ;;  %p115_p4 = scmp.lt.s32.totalorder %s16_s10, %s16_s10 }
   0xa   :  { %p111_p3 = scmp.ne.s32.totalorder %s16_s10, %s110_s18  ;;  %p116_p5 = scmp.lt.s32.totalorder %s110_s18, %s110_s18 }
   0xc   :  { %p117_p6 = por %p116_p5, %p115_p4 }
   0xe   :  { %p118_p7 = pnand %p117_p6, %p111_p3 }
  0x10   :  { %121 = shalt.err (!%p118_p7)
}
  0x11   :  { %s173_s19 = smov 128   ;;  %s174_s20 = smov 8  }
  0x12   :  { %21 = dma.hbm_to_vmem [thread:$0]  %s237_s0, 256, %s16_s10, [#allocation3], %s173_s19, %s173_s19, %s174_s20  }
  0x13   :  { %s175_s23 = smov [#allocation5]   ;;  %s122_s27 = scalar_lea.hbm %s238_s1, 256 }
  0x14   :  { %s27_s24 = sshll.u32 %s175_s23, 4  ;;  %p123_p8 = scmp.ne.s32.totalorder %s238_s1, %s122_s27  ;;  %s28_s24 = int_to_ptr.vmem [resolvable:$true] %s27_s24 }
  0x15   :  { %p126_p9 = scmp.lt.u32.totalorder %s122_s27, %s238_s1 }
  0x17   :  { %p128_p10 = pnand %p126_p9, %p123_p8 }
  0x19   :  { %131 = shalt.err (!%p128_p10)
}
  0x1a   :  { %s132_s4 = scalar_lea.vmem %s28_s24, 256  ;;  %p137_p12 = scmp.lt.s32.totalorder %s28_s24, %s28_s24 }
  0x1b   :  { %p133_p11 = scmp.ne.s32.totalorder %s28_s24, %s132_s4  ;;  %p138_p13 = scmp.lt.s32.totalorder %s132_s4, %s132_s4 }
  0x1d   :  { %p139_p0 = por %p138_p13, %p137_p12 }
  0x1f   :  { %p140_p1 = pnand %p139_p0, %p133_p11 }
  0x21   :  { %143 = shalt.err (!%p140_p1)
}
  0x22   :  { %33 = dma.hbm_to_vmem [thread:$0]  %s238_s1, 256, %s28_s24, [#allocation6], %s173_s19, %s173_s19, %s174_s20  }
  0x23   :  { %166 = dma.done.wait [#allocation3], 256  }
  0x24   :  { %167 = vsyncadd [#allocation3], 4294967040 }
  0x25   :  { %168 = dma.done.wait [#allocation6], 256  }
  0x26   :  { %169 = vsyncadd [#allocation6], 4294967040  ;;  %v40_v0 = vld [vmem:[#allocation2] sm:$0xff]  ;;  %v41_v1 = vld [vmem:[#allocation2 + $0x8] sm:$0xff]  ;;  %s176_s1 = smov [#allocation7]   ;;  %vm64_vm0 = vcmask 130048  }
  0x27   :  { %v85_v2 = vmul.f32 -1.702, %v40_v0  ;;  %v86_v3 = vmul.f32 -1.702, %v41_v1  ;;  %v42_v10 = vld [vmem:[#allocation5] sm:$0xff]  ;;  %v43_v11 = vld [vmem:[#allocation5 + $0x8] sm:$0xff] }
  0x28   :  { %v60_v12 = vadd.f32 1.0, %v42_v10  ;;  %v61_v14 = vadd.f32 1.0, %v43_v11  ;;  %s72_s6 = sshll.u32 %s176_s1, 4  ;;  %s73_s6 = int_to_ptr.vmem [resolvable:$true] %s72_s6 }
  0x29   :  { %v48_v4 = vmul.f32 1.442695, %v85_v2  ;;  %v50_v5 = vmul.f32 1.442695, %v86_v3  ;;  %s144_s7 = scalar_lea.vmem %s73_s6, 256  ;;  %p149_p3 = scmp.lt.s32.totalorder %s73_s6, %s73_s6 }
  0x2a   :  { %p145_p2 = scmp.ne.s32.totalorder %s73_s6, %s144_s7  ;;  %p150_p4 = scmp.lt.s32.totalorder %s144_s7, %s144_s7 }
  0x2b   :  { %92 = vpow2.f32 %v48_v4 }
  0x2c   :  { %94 = vpow2.f32 %v50_v5  ;;  %p151_p5 = por %p150_p4, %p149_p3 }
  0x2e   :  { %p152_p6 = pnand %p151_p5, %p145_p2 }
  0x35   :  { %v93_v6 = vpop.eup %92 }
  0x36   :  { %v95_v7 = vpop.eup %94  ;;  %v52_v8 = vadd.f32 1.0, %v93_v6 }
  0x37   :  { %v53_v9 = vadd.f32 1.0, %v95_v7 }
  0x38   :  { %96 = vrcp.f32 %v52_v8 }
  0x39   :  { %98 = vrcp.f32 %v53_v9 }
  0x42   :  { %v97_v13 = vpop.eup %96 }
  0x43   :  { %v99_v15 = vpop.eup %98  ;;  %v58_v16 = vmul.f32 %v97_v13, %v40_v0 }
  0x44   :  { %v59_v17 = vmul.f32 %v99_v15, %v41_v1 }
  0x45   :  { %v62_v18 = vmul.f32 %v60_v12, %v58_v16 }
  0x46   :  { %v63_v19 = vmul.f32 %v61_v14, %v59_v17 }
  0x47   :  { %65 = vst.msk [vmem:[#allocation7] sm:$0xff] %vm64_vm0, %v62_v18 }
  0x48   :  { %66 = vst.msk [vmem:[#allocation7 + $0x8] sm:$0xff] %vm64_vm0, %v63_v19 }
  0x49   :  { %155 = shalt.err (!%p152_p6)
}
  0x4a   :  { %s156_s10 = scalar_lea.hbm %s239_s2, 256 }
  0x4b   :  { %p157_p7 = scmp.ne.s32.totalorder %s239_s2, %s156_s10  ;;  %p160_p8 = scmp.lt.u32.totalorder %s156_s10, %s239_s2 }
  0x4d   :  { %p162_p9 = pnand %p160_p8, %p157_p7 }
  0x4f   :  { %165 = shalt.err (!%p162_p9)
}
  0x50   :  { %78 = dma.vmem_to_hbm [thread:$0]  %s73_s6, 256, %s239_s2, [#allocation4], %s173_s19, %s173_s19, %s174_s20  }
  0x51   :  { %170 = dma.done.wait [#allocation4], 256  }
  0x52   :  { %171 = vsyncadd [#allocation4], 4294967040 }
  0x53   :  { %82 = vsyncpa [#allocation3], 1 }
  0x54   :  { %83 = vsyncpa [#allocation6], 1 }
  0x55   :  { %84 = vsyncpa [#allocation4], 1 }

</bundles_post_ra>
